<compile_context>
chip_gen: v7x
topology: tpu7x:2x2x1
jax: 0.10.0
libtpu: 0.0.40
codegen_flags: <defaults>
</compile_context>

<pallas_src>
import jax
import jax.numpy as jnp
from jax.experimental import pallas as pl
from jax.experimental.pallas import tpu as pltpu


# ----------------------------------------------------------------------------
# Helpers
# ----------------------------------------------------------------------------
def _round_up(x, m):
    return ((x + m - 1) // m) * m


# ----------------------------------------------------------------------------
# Pallas kernel: out_tile = x_tile @ w_tile + bias_tile
#   x_ref: (tm, F)  bf16   w_ref: (F, tn) bf16
#   b_ref: (1, tn)  f32    o_ref: (tm, tn) f32
# ----------------------------------------------------------------------------
def _linear_bias_kernel(x_ref, w_ref, b_ref, o_ref):
    o_ref[...] = b_ref[...] + jnp.dot(
        x_ref[...], w_ref[...], preferred_element_type=jnp.float32)


def prepare_linear_params(weight, bias):
    """weight: (C, F) f32, bias: (C,) f32.

    Returns (w_t_pad, b_pad, C) where
      w_t_pad: (F, C_pad) bf16, zero-padded class columns,
      b_pad  : (1, C_pad) f32,  zero-padded,
      C_pad is a multiple of 128.
    Done once (in __init__) so no per-call transpose / cast / pad of the weight.
    """
    C, F = weight.shape
    C_pad = max(_round_up(C, 128), 128)
    w_t = jnp.transpose(weight).astype(jnp.bfloat16)              # (F, C)
    w_t_pad = jnp.pad(w_t, ((0, 0), (0, C_pad - C)))               # (F, C_pad)
    b_pad = jnp.pad(bias.astype(jnp.float32), (0, C_pad - C)).reshape(1, C_pad)
    return w_t_pad, b_pad, C


def pallas_linear(x, w_t_pad, b_pad, num_classes):
    """x: (B, F) f32, w_t_pad: (F, C_pad) bf16, b_pad: (1, C_pad) f32.

    Returns logits (B, num_classes) f32.
    """
    B, F = x.shape
    F2, C_pad = w_t_pad.shape
    assert F == F2, (F, F2)

    # --- tile sizes -----------------------------------------------------------
    # Batch tile: multiple of 8 (sublane), capped at 256.  Class tile: 256 if it
    # divides C_pad (v6e/v7x MXU width), else 128 (always divides, also fits v5e).
    tm = min(256, _round_up(B, 8))
    B_pad = _round_up(B, tm)
    tn = 256 if (C_pad >= 256 and C_pad % 256 == 0) else 128

    # --- pad activations (zero rows -> discarded after slice) ----------------
    x_p = jnp.pad(x, ((0, B_pad - B), (0, 0))).astype(jnp.bfloat16)

    # --- VMEM budget (double-buffered tiles), capped at v7x physical 64 MiB --
    working = (2 * tm * F * 2        # x tile, bf16, double buffered
               + 2 * F * tn * 2      # w tile, bf16, double buffered
               + 2 * tm * tn * 4     # out tile, f32, double buffered
               + 2 * tn * 4)         # bias tile
    vmem_limit = int(min(max(2 * working, 32 * 1024 * 1024), 64 * 1024 * 1024))

    cost = pl.CostEstimate(
        flops=2 * B_pad * F * C_pad,
        bytes_accessed=(B_pad * F * 2 + F * C_pad * 2
                        + C_pad * 4 + B_pad * C_pad * 4),
        transcendentals=0,
    )

    # Grid: class tiles OUTER, batch tiles INNER.  The weight block index
    # depends only on the outer axis, so while the inner (batch) axis varies the
    # weight tile is not re-fetched -> weight resident, activations streamed.
    grid = (C_pad // tn, B_pad // tm)

    out = pl.pallas_call(
        _linear_bias_kernel,
        out_shape=jax.ShapeDtypeStruct((B_pad, C_pad), jnp.float32),
        grid_spec=pltpu.PrefetchScalarGridSpec(
            num_scalar_prefetch=0,
            grid=grid,
            in_specs=[
                pl.BlockSpec((tm, F), lambda cj, bi: (bi, 0)),   # x
                pl.BlockSpec((F, tn), lambda cj, bi: (0, cj)),   # w (resident over bi)
                pl.BlockSpec((1, tn), lambda cj, bi: (0, cj)),   # bias
            ],
            out_specs=pl.BlockSpec((tm, tn), lambda cj, bi: (bi, cj)),
        ),
        compiler_params=pltpu.CompilerParams(
            dimension_semantics=("parallel", "parallel"),
            vmem_limit_bytes=vmem_limit,
        ),
        cost_estimate=cost,
    )(x_p, w_t_pad, b_pad)

    return out[:B, :num_classes]


# ----------------------------------------------------------------------------
# Feature construction (glue, plain JAX) — mirrors create_linear_input[_concat]
# ----------------------------------------------------------------------------
def create_linear_input(x_tokens_list, use_n_blocks, use_avgpool):
    # x_tokens_list: list of (patch_tokens (B,N,D), class_token (B,D))
    intermediate = x_tokens_list[-use_n_blocks:]
    output = jnp.concatenate([cls for _, cls in intermediate], axis=-1)
    if use_avgpool:
        avg = jnp.mean(x_tokens_list[-1][0], axis=1)
        output = jnp.concatenate((output, avg), axis=-1)
        output = output.reshape(output.shape[0], -1)
    return output.astype(jnp.float32)


def create_linear_input_concat(x_tokens_list1, x_tokens_list2, use_n_blocks,
                               use_avgpool):
    inter1 = x_tokens_list1[-use_n_blocks:]
    out1 = jnp.concatenate([cls for _, cls in inter1], axis=-1)
    inter2 = x_tokens_list2[-use_n_blocks:]
    out2 = jnp.concatenate([cls for _, cls in inter2], axis=-1)
    output = jnp.concatenate([out1, out2], axis=-1)
    if use_avgpool:
        fea = jnp.concatenate(
            (jnp.mean(inter1[-1][0], axis=1), jnp.mean(inter2[-1][0], axis=1)),
            axis=-1)
        output = jnp.concatenate((output, fea), axis=-1)
        output = output.reshape(output.shape[0], -1)
    return output.astype(jnp.float32)


# ----------------------------------------------------------------------------
# LinearClassifier
# ----------------------------------------------------------------------------
class LinearClassifier:
    def __init__(self, out_dim, use_n_blocks, use_avgpool, concat,
                 num_classes=1000, key=None):
        self.out_dim = out_dim
        self.use_n_blocks = use_n_blocks
        self.use_avgpool = use_avgpool
        self.num_classes = num_classes
        self.concat = concat
        if key is None:
            key = jax.random.PRNGKey(0)
        # nn.Linear weight: (num_classes, out_dim) ~ N(0, 0.01), bias = 0
        self.weight = (0.01 * jax.random.normal(
            key, (num_classes, out_dim), dtype=jnp.float32))
        self.bias = jnp.zeros((num_classes,), dtype=jnp.float32)
        # Precompute the transposed, bf16-cast, lane-padded weight + bias once.
        self._w_t_pad, self._b_pad, _ = prepare_linear_params(
            self.weight, self.bias)

    def __call__(self, x_tokens_list):
        if self.concat:
            output = create_linear_input_concat(
                x_tokens_list[0], x_tokens_list[1],
                self.use_n_blocks, self.use_avgpool)
        else:
            output = create_linear_input(
                x_tokens_list, self.use_n_blocks, self.use_avgpool)
        # Hot path: tiled matmul + bias in Pallas (bf16 inputs, f32 accum).
        return pallas_linear(output, self._w_t_pad, self._b_pad,
                             self.num_classes)


# ----------------------------------------------------------------------------
# Demo
# ----------------------------------------------------------------------------
if __name__ == "__main__":
    key = jax.random.PRNGKey(0)

    B, N, D = 2, 8, 32          # batch, patch tokens, embed dim
    use_n_blocks = 2
    use_avgpool = True
    num_classes = 16
    out_dim = use_n_blocks * D + D   # 2 class-token blocks + avgpool of last

    # Build a list of (patch_tokens, class_token) tuples, one per block.
    n_blocks_total = 3
    keys = jax.random.split(key, 2 * n_blocks_total + 1)
    x_tokens_list = []
    for i in range(n_blocks_total):
        patch = jax.random.normal(keys[2 * i], (B, N, D), dtype=jnp.float32)
        cls = jax.random.normal(keys[2 * i + 1], (B, D), dtype=jnp.float32)
        x_tokens_list.append((patch, cls))

    clf = LinearClassifier(out_dim, use_n_blocks, use_avgpool,
                           concat=False, num_classes=num_classes,
                           key=keys[-1])

    logits = clf(x_tokens_list)
    logits = jax.block_until_ready(logits)

    # Reference check in plain JAX (f32).  Kernel uses bf16 inputs with f32
    # accumulation, so compare with a bf16-appropriate tolerance.
    feats = create_linear_input(x_tokens_list, use_n_blocks, use_avgpool)
    ref = feats @ clf.weight.T + clf.bias
    assert logits.shape == (B, num_classes)
    assert jnp.allclose(logits, ref, atol=2e-2), "mismatch vs reference"

    print("KERNEL_OK")
</pallas_src>

<mosaic_0001>
module attributes {stable_mosaic.version = 11 : i64} {
  func.func @_linear_bias_kernel(%arg0: i32, %arg1: i32, %arg2: memref<8x96xbf16, #tpu.memory_space<vmem>>, %arg3: memref<96x128xbf16, #tpu.memory_space<vmem>>, %arg4: memref<1x128xf32, #tpu.memory_space<vmem>>, %arg5: memref<8x128xf32, #tpu.memory_space<vmem>>) attributes {dimension_semantics = [#tpu.dimension_semantics<parallel>, #tpu.dimension_semantics<parallel>], iteration_bounds = array<i64: 1, 1>, scalar_prefetch = 0 : i64, scratch_operands = 0 : i64, tpu.core_type = #tpu.core_type<tc>, window_params = [{transform_indices = @transform_0, window_bounds = array<i64: 8, 96>}, {transform_indices = @transform_1, window_bounds = array<i64: 96, 128>}, {transform_indices = @transform_2, window_bounds = array<i64: 1, 128>}, {transform_indices = @transform_3, window_bounds = array<i64: 8, 128>}]} {
    %c0 = arith.constant 0 : index
    %c0_0 = arith.constant 0 : index
    %0 = vector.load %arg4[%c0, %c0_0] : memref<1x128xf32, #tpu.memory_space<vmem>>, vector<1x128xf32>
    %c0_1 = arith.constant 0 : index
    %c0_2 = arith.constant 0 : index
    %1 = vector.load %arg2[%c0_1, %c0_2] : memref<8x96xbf16, #tpu.memory_space<vmem>>, vector<8x96xbf16>
    %c0_3 = arith.constant 0 : index
    %c0_4 = arith.constant 0 : index
    %2 = vector.load %arg3[%c0_3, %c0_4] : memref<96x128xbf16, #tpu.memory_space<vmem>>, vector<96x128xbf16>
    %cst = arith.constant dense<0.000000e+00> : vector<8x128xf32>
    %3 = tpu.matmul %1, %2, %cst {dimension_numbers = #tpu.dot_dimension_numbers<[1], [0], [0], [1], [0, 0, 1, 1], [], []>} : vector<8x96xbf16>, vector<96x128xbf16>, vector<8x128xf32> -> vector<8x128xf32>
    %4 = vector.broadcast %0 : vector<1x128xf32> to vector<8x128xf32>
    %5 = arith.addf %4, %3 : vector<8x128xf32>
    %c0_5 = arith.constant 0 : index
    %c0_6 = arith.constant 0 : index
    %6 = vector.load %arg5[%c0_5, %c0_6] : memref<8x128xf32, #tpu.memory_space<vmem>>, vector<8x128xf32>
    tpu.vector_store %arg5[%c0_5, %c0_6], %5 {strides = array<i32>} : memref<8x128xf32, #tpu.memory_space<vmem>>, vector<8x128xf32>,
    return
  }
  func.func @transform_0(%arg0: i32, %arg1: i32) -> (i32, i32) {
    %c0_i32 = arith.constant 0 : i32
    %c0_i32_0 = arith.constant 0 : i32
    return %arg1, %c0_i32 : i32, i32
  }
  func.func @transform_1(%arg0: i32, %arg1: i32) -> (i32, i32) {
    %c0_i32 = arith.constant 0 : i32
    %c0_i32_0 = arith.constant 0 : i32
    return %c0_i32, %arg0 : i32, i32
  }
  func.func @transform_2(%arg0: i32, %arg1: i32) -> (i32, i32) {
    %c0_i32 = arith.constant 0 : i32
    %c0_i32_0 = arith.constant 0 : i32
    return %c0_i32, %arg0 : i32, i32
  }
  func.func @transform_3(%arg0: i32, %arg1: i32) -> (i32, i32) {
    %c0_i32 = arith.constant 0 : i32
    return %arg1, %arg0 : i32, i32
  }
}

</mosaic_0001>

<bundles_post_ra>
// kernel: tpu_custom_call.1
= control target key start
LH: loop header
LB: loop body
LE: loop exit
PB: predicated region body
PF: predicated region fallthrough
CT: control target
= control target key end

     0   :  { %8 = vsyncpa [#allocation3], 0  ;;  %s349_s0 = inlined_call_operand.hbm [shape: bf16[8,96], index: 0, kind: input, shape index: {}]   ;;  %s350_s1 = inlined_call_operand.hbm [shape: bf16[96,128], index: 1, kind: input, shape index: {}]   ;;  %s351_s2 = inlined_call_operand.vmem [shape: f32[1,128], index: 2, kind: input, shape index: {}]   ;;  %s352_s3 = inlined_call_operand.hbm [shape: f32[8,128], index: 3, kind: output, shape index: {}]  }
   0x1   :  { %9 = vsyncpa [#allocation6], 0 }
   0x2   :  { %10 = vsyncpa [#allocation4], 0  ;;  %s276_s12 = smov [#allocation2]   ;;  %s277_s14 = smov [#allocation5]  }
   0x3   :  { %s17_s13 = sshll.u32 %s276_s12, 4  ;;  %s26_s15 = sshll.u32 %s277_s14, 4  ;;  %s18_s13 = int_to_ptr.vmem [resolvable:$true] %s17_s13  ;;  %s303_s15 = int_to_ptr.vmem [resolvable:$true] %s26_s15 }
   0x4   :  { %s204_s18 = scalar_lea.hbm %s349_s0, 64 }
   0x5   :  { %p205_p0 = scmp.ne.s32.totalorder %s349_s0, %s204_s18  ;;  %p208_p1 = scmp.lt.u32.totalorder %s204_s18, %s349_s0 }
   0x7   :  { %p210_p2 = pnand %p208_p1, %p205_p0 }
   0x9   :  { %213 = shalt.err (!%p210_p2)
}
   0xa   :  { %s214_s23 = scalar_lea.vmem %s18_s13, 64  ;;  %p219_p4 = scmp.lt.s32.totalorder %s18_s13, %s18_s13 }
   0xb   :  { %p215_p3 = scmp.ne.s32.totalorder %s18_s13, %s214_s23  ;;  %p220_p5 = scmp.lt.s32.totalorder %s214_s23, %s214_s23 }
   0xd   :  { %p221_p6 = por %p220_p5, %p219_p4 }
   0xf   :  { %p222_p7 = pnand %p221_p6, %p215_p3 }
  0x11   :  { %225 = shalt.err (!%p222_p7)
}
  0x12   :  { %20 = dma.hbm_to_vmem [thread:$0]  %s349_s0, 64, %s18_s13, [#allocation3]  }
  0x13   :  { %s226_s28 = scalar_lea.hbm %s350_s1, 768 }
  0x14   :  { %p227_p8 = scmp.ne.s32.totalorder %s350_s1, %s226_s28  ;;  %p230_p9 = scmp.lt.u32.totalorder %s226_s28, %s350_s1 }
  0x16   :  { %p232_p10 = pnand %p230_p9, %p227_p8 }
  0x18   :  { %235 = shalt.err (!%p232_p10)
}
  0x19   :  { %s236_s6 = scalar_lea.vmem %s303_s15, 768  ;;  %p241_p12 = scmp.lt.s32.totalorder %s303_s15, %s303_s15 }
  0x1a   :  { %p237_p11 = scmp.ne.s32.totalorder %s303_s15, %s236_s6  ;;  %p242_p13 = scmp.lt.s32.totalorder %s236_s6, %s236_s6 }
  0x1c   :  { %p243_p0 = por %p242_p13, %p241_p12 }
  0x1e   :  { %p244_p1 = pnand %p243_p0, %p237_p11 }
  0x20   :  { %247 = shalt.err (!%p244_p1)
}
  0x21   :  { %s278_s0 = smov 64   ;;  %s279_s7 = smov 4  }
  0x22   :  { %32 = dma.hbm_to_vmem [thread:$0]  %s350_s1, 768, %s303_s15, [#allocation6], %s278_s0, %s278_s0, %s279_s7  }
  0x23   :  { %270 = dma.done.wait [#allocation3], 64  }
  0x24   :  { %271 = vsyncadd [#allocation3], 4294967232 }
  0x25   :  { %272 = dma.done.wait [#allocation6], 768  }
  0x26   :  { %273 = vsyncadd [#allocation6], 4294966528  ;;  %v280_v0 = vmov 0.0   ;;  %vm281_vm0 = vmmov 0   ;;  %v198_v1 = vld [vmem:[#allocation5] sm:$0xff]   ;;  %v199_v2 = vld [vmem:[#allocation5 + $0x8] sm:$0xff]  }
  0x27   :  { %175 = vmatprep.subr.bf16.mxu0 %v280_v0  ;;  %187 = vmatprep.mubr.msk.bf16.mxu0 %vm281_vm0, %v280_v0  ;;  %v200_v3 = vld [vmem:[#allocation5 + $0x10] sm:$0xff]   ;;  %v201_v4 = vld [vmem:[#allocation5 + $0x18] sm:$0xff]   ;;  %v202_v5 = vld [vmem:[#allocation5 + $0x20] sm:$0xff]   ;;  %vm92_vm1 = vcmask 785408   ;;  %s282_s11 = smov [#allocation7]  }
  0x28   :  { %176 = vmatpush3.bf16.msra.mxu0 %v198_v1  ;;  %v203_v6 = vld [vmem:[#allocation5 + $0x28] sm:$0xff]   ;;  %v43_v7 = vld [vmem:[#allocation2] sm:$0xf]  ;;  %s150_s12 = sshll.u32 %s282_s11, 4  ;;  %s151_s12 = int_to_ptr.vmem [resolvable:$true] %s150_s12 }
  0x29   :  { %177 = vmatprep.subr.bf16.mxu0 %v280_v0  ;;  %v167_v8 = vld [vmem:[%s351_s2] ss:$0 sm:$0xff]  ;;  %s248_s13 = scalar_lea.vmem %s151_s12, 128  ;;  %p253_p3 = scmp.lt.s32.totalorder %s151_s12, %s151_s12 }
  0x2a   :  { %p249_p2 = scmp.ne.s32.totalorder %s151_s12, %s248_s13  ;;  %p254_p4 = scmp.lt.s32.totalorder %s248_s13, %s248_s13 }
  0x2c   :  { %178 = vmatpush3.bf16.msra.mxu0 %v199_v2  ;;  %p255_p5 = por %p254_p4, %p253_p3 }
  0x2d   :  { %179 = vmatprep.subr.bf16.mxu0 %v280_v0 }
  0x2e   :  { %p256_p6 = pnand %p255_p5, %p249_p2 }
  0x30   :  { %180 = vmatpush3.bf16.msra.mxu0 %v200_v3 }
  0x31   :  { %181 = vmatprep.subr.bf16.mxu0 %v280_v0 }
  0x34   :  { %182 = vmatpush3.bf16.msra.mxu0 %v201_v4 }
  0x35   :  { %183 = vmatprep.subr.bf16.mxu0 %v280_v0 }
  0x38   :  { %184 = vmatpush3.bf16.msra.mxu0 %v202_v5 }
  0x39   :  { %185 = vmatprep.subr.bf16.mxu0 %v280_v0 }
  0x3c   :  { %186 = vmatpush3.bf16.msra.mxu0 %v203_v6 }
  0x3f   :  { %188 = vmatmul.mubr.msk.bf16.vlgmr.msra.gmra.mrb[0].mxu0 %vm92_vm1, %v43_v7 }
 0x112   :  { %v130_v9 = vpop.f32.mrb[0].mxu0 }
 0x113   :  { %v142_v10 = vadd.f32 %v167_v8, %v130_v9  ;;  %v189_v11 = vpop.f32.mrb[1].mxu0 }
 0x114   :  { %v133_v12 = vpop.f32.mrb[2].mxu0 }
 0x115   :  { %143 = vst [vmem:[#allocation7] sm:$0xff] %v142_v10  ;;  %v190_v13 = vpop.f32.mrb[3].mxu0 }
 0x116   :  { %259 = shalt.err (!%p256_p6)
}
 0x117   :  { %s260_s2 = scalar_lea.hbm %s352_s3, 128 }
 0x118   :  { %p261_p7 = scmp.ne.s32.totalorder %s352_s3, %s260_s2  ;;  %p264_p8 = scmp.lt.u32.totalorder %s260_s2, %s352_s3 }
 0x11a   :  { %p266_p9 = pnand %p264_p8, %p261_p7 }
 0x11c   :  { %269 = shalt.err (!%p266_p9)
}
 0x11d   :  { %153 = dma.vmem_to_hbm [thread:$0]  %s151_s12, 128, %s352_s3, [#allocation4]  }
 0x11e   :  { %274 = dma.done.wait [#allocation4], 128  }
 0x11f   :  { %275 = vsyncadd [#allocation4], 4294967168 }
 0x120   :  { %157 = vsyncpa [#allocation3], 1 }
 0x121   :  { %158 = vsyncpa [#allocation6], 1 }
 0x122   :  { %159 = vsyncpa [#allocation4], 1 }

</bundles_post_ra>
